<compile_context>
chip_gen: v6e
topology: v6e:2x2x1
jax: 0.10.0
libtpu: 0.0.40
codegen_flags: <defaults>
</compile_context>

<pallas_src>
import jax
import jax.numpy as jnp
from jax.experimental import pallas as pl
from jax.experimental.pallas import tpu as pltpu

_LANE = 1024  # lane-dense last dim (large multiple of 128 -> unmasked vector stores)


def _affine_kernel(w_ref, b_ref, x_ref, o_ref):
    # w_ref, b_ref are shape-(1,) SMEM scalars (matching nn.Parameter(torch.randn(1))).
    w = w_ref[0]
    b = b_ref[0]
    o_ref[...] = (w * x_ref[...] + b).astype(o_ref.dtype)


def _round_up(v: int, m: int) -> int:
    return ((v + m - 1) // m) * m


def _device_tile_params():
    """Pick max block rows / multi-core flag from the TPU generation (trace-time)."""
    kind = ""
    try:
        kind = (getattr(jax.devices()[0], "device_kind", "") or "").lower()
    except Exception:
        pass
    if "v5" in kind:
        max_block_rows = 1024   # 4 MiB f32 tile; 16 MiB double-buffered in+out
    else:
        max_block_rows = 2048   # 8 MiB f32 tile (v6e / v7x / unknown); 32 MiB footprint
    multi_core = "v7" in kind   # v7x: 2 TensorCores per chip
    return max_block_rows, multi_core


def _run_affine_2d(x2d, weights, bias, max_block_rows, sub, multi_core):
    rows = x2d.shape[0]
    block_rows = max_block_rows
    if rows <= block_rows:
        if multi_core and rows >= 2 * sub:
            # Force a 2-block grid so dimension_semantics=("parallel",) uses both TCs.
            block_rows = _round_up(pl.cdiv(rows, 2), sub)
        else:
            # Full-extent block: exempt from the (8,128) divisibility constraint.
            block_rows = rows
    grid = (pl.cdiv(rows, block_rows),)  # boundary block (if any) is masked by Pallas
    itemsize = jnp.dtype(x2d.dtype).itemsize

    return pl.pallas_call(
        _affine_kernel,
        out_shape=jax.ShapeDtypeStruct(x2d.shape, x2d.dtype),
        grid=grid,
        in_specs=[
            pl.BlockSpec(memory_space=pltpu.SMEM),                  # weights (1,)
            pl.BlockSpec(memory_space=pltpu.SMEM),                  # bias    (1,)
            pl.BlockSpec((block_rows, _LANE), lambda i: (i, 0)),    # x tile
        ],
        out_specs=pl.BlockSpec((block_rows, _LANE), lambda i: (i, 0)),
        compiler_params=pltpu.CompilerParams(
            dimension_semantics=("parallel",),                      # no reduction axis
            vmem_limit_bytes=48 << 20,                              # fits v7x's 64 MiB VMEM
        ),
        cost_estimate=pl.CostEstimate(
            flops=2 * rows * _LANE,
            transcendentals=0,
            bytes_accessed=2 * rows * _LANE * itemsize,
        ),
    )(weights, bias, x2d)


@jax.jit
def linear_regression_v2(x: jax.Array, weights: jax.Array, bias: jax.Array) -> jax.Array:
    """Pallas TPU implementation of: weights * x + bias (scalar affine)."""
    assert weights.shape == (1,) and bias.shape == (1,)
    orig_shape = x.shape
    dtype = x.dtype
    n = x.size
    if n == 0:
        return x

    flat = x.reshape(-1)
    sub = max(8, 32 // jnp.dtype(dtype).itemsize)  # dtype-aware sublane granularity
    max_block_rows, multi_core = _device_tile_params()

    rows = n // _LANE              # full lane-aligned rows (zero-copy prefix)
    n_prefix = rows * _LANE

    if rows > 0:
        x2d = flat[:n_prefix].reshape(rows, _LANE)
        out2d = _run_affine_2d(x2d, weights, bias, max_block_rows, sub, multi_core)
        if n_prefix == n:
            # Fully aligned: zero-copy reshape in, zero-copy reshape out.
            return out2d.reshape(orig_shape)
        # Ragged tail (< _LANE elements): negligible traffic, plain jnp.
        tail = flat[n_prefix:]
        tail_out = (weights[0] * tail + bias[0]).astype(dtype)
        return jnp.concatenate([out2d.reshape(-1), tail_out]).reshape(orig_shape)

    # Tiny input (< one lane row): handled entirely by the scalar-affine tail path.
    return (weights[0] * flat + bias[0]).astype(dtype).reshape(orig_shape)


if __name__ == "__main__":
    key = jax.random.PRNGKey(0)
    kx, kw, kb, kx2, kx3 = jax.random.split(key, 5)

    # Deterministic "parameters" standing in for torch.randn(1) inits.
    weights = jax.random.normal(kw, (1,), dtype=jnp.float32)
    bias = jax.random.normal(kb, (1,), dtype=jnp.float32)

    # Lane-aligned small input (2048 elems): pure zero-copy reshape + pallas path.
    x = jax.random.normal(kx, (16, 128), dtype=jnp.float32)
    y = jax.block_until_ready(linear_regression_v2(x, weights, bias))
    ref = weights[0] * x + bias[0]
    assert jnp.allclose(y, ref, atol=1e-6), "mismatch vs reference (aligned shape)"

    # Misaligned input (5000 elems): kernel on the aligned prefix + jnp ragged tail.
    x2 = jax.random.normal(kx2, (5, 1000), dtype=jnp.float32)
    y2 = jax.block_until_ready(linear_regression_v2(x2, weights, bias))
    ref2 = weights[0] * x2 + bias[0]
    assert jnp.allclose(y2, ref2, atol=1e-6), "mismatch vs reference (misaligned shape)"

    # Tiny odd shape (105 elems): fully handled by the tail path.
    x3 = jax.random.normal(kx3, (3, 5, 7), dtype=jnp.float32)
    y3 = jax.block_until_ready(linear_regression_v2(x3, weights, bias))
    ref3 = weights[0] * x3 + bias[0]
    assert jnp.allclose(y3, ref3, atol=1e-6), "mismatch vs reference (tiny shape)"

    print("KERNEL_OK")
</pallas_src>

<mosaic_0001>
module attributes {stable_mosaic.version = 11 : i64} {
  func.func @_affine_kernel(%arg0: i32, %arg1: memref<1xf32, #tpu.memory_space<smem>>, %arg2: memref<1xf32, #tpu.memory_space<smem>>, %arg3: memref<2x1024xf32, #tpu.memory_space<vmem>>, %arg4: memref<2x1024xf32, #tpu.memory_space<vmem>>) attributes {dimension_semantics = [#tpu.dimension_semantics<parallel>], iteration_bounds = array<i64: 1>, scalar_prefetch = 0 : i64, scratch_operands = 0 : i64, tpu.core_type = #tpu.core_type<tc>, window_params = [{transform_indices = @transform_0, window_bounds = array<i64: 1>}, {transform_indices = @transform_1, window_bounds = array<i64: 1>}, {transform_indices = @transform_2, window_bounds = array<i64: 2, 1024>}, {transform_indices = @transform_3, window_bounds = array<i64: 2, 1024>}]} {
    %c0 = arith.constant 0 : index
    %0 = memref.load %arg1[%c0] : memref<1xf32, #tpu.memory_space<smem>>
    %c0_0 = arith.constant 0 : index
    %1 = memref.load %arg2[%c0_0] : memref<1xf32, #tpu.memory_space<smem>>
    %c0_1 = arith.constant 0 : index
    %c0_2 = arith.constant 0 : index
    %2 = vector.load %arg3[%c0_1, %c0_2] : memref<2x1024xf32, #tpu.memory_space<vmem>>, vector<2x1024xf32>
    %3 = vector.broadcast %0 : f32 to vector<2x1024xf32>
    %4 = arith.mulf %3, %2 : vector<2x1024xf32>
    %5 = vector.broadcast %1 : f32 to vector<2x1024xf32>
    %6 = arith.addf %4, %5 : vector<2x1024xf32>
    %c0_3 = arith.constant 0 : index
    %c0_4 = arith.constant 0 : index
    %7 = vector.load %arg4[%c0_3, %c0_4] : memref<2x1024xf32, #tpu.memory_space<vmem>>, vector<2x1024xf32>
    tpu.vector_store %arg4[%c0_3, %c0_4], %6 {strides = array<i32>} : memref<2x1024xf32, #tpu.memory_space<vmem>>, vector<2x1024xf32>,
    return
  }
  func.func @transform_0(%arg0: i32) -> i32 {
    %c0_i32 = arith.constant 0 : i32
    %c0_i32_0 = arith.constant 0 : i32
    return %c0_i32 : i32
  }
  func.func @transform_1(%arg0: i32) -> i32 {
    %c0_i32 = arith.constant 0 : i32
    %c0_i32_0 = arith.constant 0 : i32
    return %c0_i32 : i32
  }
  func.func @transform_2(%arg0: i32) -> (i32, i32) {
    %c0_i32 = arith.constant 0 : i32
    %c0_i32_0 = arith.constant 0 : i32
    return %arg0, %c0_i32 : i32, i32
  }
  func.func @transform_3(%arg0: i32) -> (i32, i32) {
    %c0_i32 = arith.constant 0 : i32
    %c0_i32_0 = arith.constant 0 : i32
    return %arg0, %c0_i32 : i32, i32
  }
}

</mosaic_0001>

<bundles_post_ra>
// kernel: linear_regression_v2.1
= control target key start
LH: loop header
LB: loop body
LE: loop exit
PB: predicated region body
PF: predicated region fallthrough
CT: control target
= control target key end

     0   :  { %s70_s0 = inlined_call_operand.<no memory space> [shape: f32[1], index: 0, kind: input, shape index: {}]   ;;  %s71_s1 = inlined_call_operand.<no memory space> [shape: f32[1], index: 1, kind: input, shape index: {}]   ;;  %s72_s2 = inlined_call_operand.vmem [shape: f32[2,1024], index: 2, kind: input, shape index: {}]   ;;  %s73_s3 = inlined_call_operand.vmem [shape: f32[2,1024], index: 3, kind: output, shape index: {}]  }
   0x1   :  { %v18_v0 = vld [vmem:[%s72_s2] sm:$0xff]  ;;  %v20_v1 = vstv %s70_s0  ;;  %v23_v2 = vstv %s71_s1  ;;  %v19_v3 = vld [vmem:[%s72_s2 + $0x8] sm:$0xff] }
   0x2   :  { %v21_v4 = vmul.f32 %v20_v1, %v18_v0  ;;  %v22_v5 = vmul.f32 %v20_v1, %v19_v3 }
   0x4   :  { %v24_v6 = vadd.f32 %v23_v2, %v21_v4  ;;  %v25_v7 = vadd.f32 %v23_v2, %v22_v5 }
   0x6   :  { %26 = vst [vmem:[%s73_s3] sm:$0xff] %v24_v6  ;;  %27 = vst [vmem:[%s73_s3 + $0x8] sm:$0xff] %v25_v7 }

</bundles_post_ra>
